<compile_context>
chip_gen: v5e
topology: v5e:2x2
jax: 0.10.0
libtpu: 0.0.40
codegen_flags: <defaults>
</compile_context>

<pallas_src>
import math

import jax
import jax.numpy as jnp
from jax import lax
from jax.experimental import pallas as pl
from jax.experimental.pallas import tpu as pltpu


# ---------------------------------------------------------------------------
# helpers
# ---------------------------------------------------------------------------
def _round_up(x, m):
    return ((x + m - 1) // m) * m


def _pick_tile(dim, target, align):
    """Largest multiple of `align` that divides `dim` and is <= target, else full dim."""
    if dim <= target or dim % align != 0:
        return dim
    t = (target // align) * align
    while t >= align:
        if dim % t == 0:
            return t
        t -= align
    return dim


# ---------------------------------------------------------------------------
# Generic tiled linear:  y = x @ w + b      (x: [M,K], w: [K,N], b: [N])
# ---------------------------------------------------------------------------
def _linear_kernel(x_ref, w_ref, b_ref, o_ref, acc_ref):
    k = pl.program_id(2)

    @pl.when(k == 0)
    def _():
        acc_ref[...] = jnp.zeros_like(acc_ref[...])

    acc_ref[...] += jnp.dot(x_ref[...], w_ref[...],
                            preferred_element_type=jnp.float32)

    @pl.when(k == pl.num_programs(2) - 1)
    def _():
        o_ref[...] = (acc_ref[...] + b_ref[...]).astype(o_ref.dtype)


def linear(x2d, w, b, *, tile_m=512, tile_n=512, tile_k=1024):
    """y = x2d @ w + b with a tiled MXU kernel (f32 accumulation)."""
    M, K = x2d.shape
    K2, N = w.shape
    assert K == K2 and b.shape == (N,)
    itemsize = x2d.dtype.itemsize
    sub = 8 if itemsize >= 4 else 16          # sublane alignment (16 for bf16)

    # Pad rows so the M axis always tiles cleanly (no full-dim fallback blow-up
    # for unaligned batch*seq); padded rows are sliced off afterwards.
    tm = min(tile_m, _round_up(M, sub))
    Mp = _round_up(M, tm)
    if Mp != M:
        x2d = jnp.pad(x2d, ((0, Mp - M), (0, 0)))

    # TODO(synk): N / K that are not 128-aligned fall back to one full-dim block;
    #             pad the weights instead if such shapes ever get large.
    tn = _pick_tile(N, tile_n, 128)
    tk = _pick_tile(K, tile_k, 128)
    b2d = b.reshape(1, N)

    cost = pl.CostEstimate(
        flops=2 * Mp * N * K, transcendentals=0,
        bytes_accessed=(Mp * K + K * N + Mp * N + N) * itemsize)

    # Double-buffered input/output tiles + f32 accumulator, with headroom,
    # capped at 48 MiB so it stays under v7x's 64 MiB physical VMEM.
    vmem_bytes = (2 * (tm * tk + tk * tn + tn) + 2 * tm * tn) * itemsize + tm * tn * 4
    vmem_limit = int(min(max(vmem_bytes + (8 << 20), 32 << 20), 48 << 20))

    out = pl.pallas_call(
        _linear_kernel,
        out_shape=jax.ShapeDtypeStruct((Mp, N), x2d.dtype),
        grid_spec=pltpu.PrefetchScalarGridSpec(
            num_scalar_prefetch=0,
            grid=(Mp // tm, N // tn, K // tk),
            in_specs=[
                pl.BlockSpec((tm, tk), lambda i, j, k: (i, k)),   # activations
                # TODO(synk): pipeline_mode=pl.Buffered(3) on this spec if profiles
                #             show exposed DMA on the K axis.
                pl.BlockSpec((tk, tn), lambda i, j, k: (k, j)),   # weight slab
                pl.BlockSpec((1, tn), lambda i, j, k: (0, j)),    # bias
            ],
            out_specs=pl.BlockSpec((tm, tn), lambda i, j, k: (i, j)),
            scratch_shapes=[pltpu.VMEM((tm, tn), jnp.float32)],
        ),
        compiler_params=pltpu.CompilerParams(
            dimension_semantics=("parallel", "parallel", "arbitrary"),
            vmem_limit_bytes=vmem_limit),
        cost_estimate=cost,
    )(x2d, w, b2d)
    return out[:M] if Mp != M else out


# ---------------------------------------------------------------------------
# Weight-side preprocessing for attention
# ---------------------------------------------------------------------------
def _prepare_qkv_params(w_qkv, b_qkv, num_heads, head_dim):
    """Reorder the fused QKV projection columns from torch's per-head
    [q_h | k_h | v_h] interleave to [Q_heads | K_heads | V_heads] (head-major
    inside each section) and fold the 1/sqrt(head_dim) attention scale into the
    Q columns.  Pure weight-side work, zero activation traffic."""
    d_model = num_heads * head_dim
    w = w_qkv.reshape(d_model, num_heads, 3, head_dim)
    w = jnp.transpose(w, (0, 2, 1, 3)).reshape(d_model, 3 * d_model)
    b = jnp.transpose(b_qkv.reshape(num_heads, 3, head_dim), (1, 0, 2))
    b = b.reshape(3 * d_model)
    scale = 1.0 / math.sqrt(head_dim)
    col_scale = jnp.concatenate([
        jnp.full((d_model,), scale, w.dtype),
        jnp.ones((2 * d_model,), w.dtype)])
    return w * col_scale, b * col_scale


# ---------------------------------------------------------------------------
# Flash-style attention on the packed [B, S, 3*d_model] QKV buffer
# ---------------------------------------------------------------------------
def _make_flash_kernel(head_offsets, head_dim, has_mask, shared_kv):
    """head_offsets: per-head (q_col, k_col, v_col) offsets inside the loaded
    blocks.  `shared_kv`: the K and V columns live in one full-row block."""
    D = head_dim
    KV_AXIS = 3

    def kernel(*refs):
        idx = 0
        q_ref = refs[idx]; idx += 1
        k_ref = refs[idx]; idx += 1
        if shared_kv:
            v_ref = k_ref
        else:
            v_ref = refs[idx]; idx += 1
        mask_ref = None
        if has_mask:
            mask_ref = refs[idx]; idx += 1
        o_ref = refs[idx]
        m_ref, l_ref, acc_ref = refs[idx + 1:idx + 4]

        ki = pl.program_id(KV_AXIS)

        @pl.when(ki == 0)
        def _():
            m_ref[...] = jnp.full(m_ref.shape, -jnp.inf, dtype=m_ref.dtype)
            l_ref[...] = jnp.zeros_like(l_ref[...])
            acc_ref[...] = jnp.zeros_like(acc_ref[...])

        q = q_ref[0]                       # (tq,  block_width)
        k = k_ref[0]                       # (tkv, block_width)
        v = v_ref[0]
        mask = mask_ref[...] if has_mask else None

        # Contract the last dim of both operands directly (no explicit k.T op).
        # TODO(synk): verify in the lowered MLIR that Mosaic does not insert an
        #             XLU transpose of the K tile; feed K pre-transposed otherwise.
        dn = (((1,), (1,)), ((), ()))
        for h, (qo, ko, vo) in enumerate(head_offsets):
            # scale 1/sqrt(D) is already folded into the Q projection columns.
            s = lax.dot_general(q[:, qo:qo + D], k[:, ko:ko + D], dn,
                                preferred_element_type=jnp.float32)   # (tq, tkv)
            if has_mask:
                s = s + mask
            m_prev = m_ref[:, h:h + 1]
            m_new = jnp.maximum(m_prev, jnp.max(s, axis=-1, keepdims=True))
            alpha = jnp.exp(m_prev - m_new)
            p = jnp.exp(s - m_new)
            l_ref[:, h:h + 1] = alpha * l_ref[:, h:h + 1] + jnp.sum(
                p, axis=-1, keepdims=True)
            acc_ref[:, qo:qo + D] = alpha * acc_ref[:, qo:qo + D] + jnp.dot(
                p.astype(v.dtype), v[:, vo:vo + D],
                preferred_element_type=jnp.float32)
            m_ref[:, h:h + 1] = m_new

        @pl.when(ki == pl.num_programs(KV_AXIS) - 1)
        def _():
            # EUP reciprocal; normalize the (tq, D) accumulator, not the (tq, S)
            # probabilities.
            inv = pl.reciprocal(l_ref[...], approx=True)
            for h, (qo, _, _) in enumerate(head_offsets):
                o_ref[0, :, qo:qo + D] = (
                    acc_ref[:, qo:qo + D] * inv[:, h:h + 1]).astype(o_ref.dtype)

    return kernel


def flash_attention(qkv, mask, *, num_heads, head_dim):
    """qkv: [B, S, 3*d_model] laid out [Q_heads | K_heads | V_heads] (scale folded
    into Q).  Returns merged per-head attention output [B, S, d_model]."""
    batch, seq, three_dm = qkv.shape
    d_model = num_heads * head_dim
    assert three_dm == 3 * d_model
    itemsize = qkv.dtype.itemsize
    sub = 8 if itemsize >= 4 else 16

    # Sequence tiles (divisors of S; full S for tiny / unaligned sequences).
    # TODO(synk): for huge S not divisible by 8/128, pad S instead of using one block.
    tq = _pick_tile(seq, 256, sub)
    tkv = _pick_tile(seq, 512, 128) if seq % 128 == 0 else _pick_tile(seq, 512, sub)

    # Group heads so the block's lane dim is a multiple of 128 (lane-dense loads
    # and unmasked stores); e.g. head_dim=64 -> 2 heads/block, head_dim=128 -> 1.
    if head_dim % 128 == 0:
        g = 1
    elif 128 % head_dim == 0 and num_heads % (128 // head_dim) == 0:
        g = 128 // head_dim
    else:
        g = None                                   # tiny-model fallback below

    has_mask = mask is not None
    mask_ops, mask_specs = (), []
    if has_mask:
        # TODO(synk): only a single additive (S, S) mask broadcast over batch and
        #             heads is supported (matches the module's common usage).
        mask_arr = jnp.broadcast_to(mask, (seq, seq)).astype(jnp.float32)
        mask_ops = (mask_arr,)
        mask_specs = [pl.BlockSpec((tq, tkv), lambda b, gi, qi, ki: (qi, ki))]

    if g is not None:
        # Lane-dense path: one block = `g` heads' worth of q (or k, or v) columns.
        hg = num_heads // g
        gw = g * head_dim
        grid = (batch, hg, seq // tq, seq // tkv)
        in_specs = [
            pl.BlockSpec((1, tq, gw), lambda b, gi, qi, ki: (b, qi, gi)),          # q
            pl.BlockSpec((1, tkv, gw), lambda b, gi, qi, ki: (b, ki, hg + gi)),     # k
            pl.BlockSpec((1, tkv, gw), lambda b, gi, qi, ki: (b, ki, 2 * hg + gi)), # v
        ] + mask_specs
        operands = (qkv, qkv, qkv) + mask_ops
        head_offsets = [(h * head_dim, h * head_dim, h * head_dim) for h in range(g)]
        out_width = gw
        out_spec = pl.BlockSpec((1, tq, gw), lambda b, gi, qi, ki: (b, qi, gi))
        shared_kv = False
        in_bytes = (tq * gw + 2 * tkv * gw) * itemsize
    else:
        # Small-model fallback (d_model < 128): blocks span the full qkv row so the
        # last block dim equals the array dim; all heads handled in one grid step.
        row_w = 3 * d_model
        grid = (batch, 1, seq // tq, seq // tkv)
        in_specs = [
            pl.BlockSpec((1, tq, row_w), lambda b, gi, qi, ki: (b, qi, 0)),   # q rows
            pl.BlockSpec((1, tkv, row_w), lambda b, gi, qi, ki: (b, ki, 0)),  # k/v rows
        ] + mask_specs
        operands = (qkv, qkv) + mask_ops
        head_offsets = [(h * head_dim, d_model + h * head_dim,
                         2 * d_model + h * head_dim) for h in range(num_heads)]
        out_width = d_model
        out_spec = pl.BlockSpec((1, tq, d_model), lambda b, gi, qi, ki: (b, qi, 0))
        shared_kv = True
        in_bytes = (tq * row_w + tkv * row_w) * itemsize

    n_hb = len(head_offsets)
    if has_mask:
        in_bytes += tq * tkv * 4
    out_bytes = tq * out_width * itemsize
    scratch_bytes = tq * (2 * n_hb + out_width) * 4
    vmem_limit = int(min(max(2 * (in_bytes + out_bytes) + scratch_bytes + (8 << 20),
                             32 << 20), 48 << 20))

    cost = pl.CostEstimate(
        flops=4 * batch * num_heads * seq * seq * head_dim,
        transcendentals=batch * num_heads * seq * seq,
        bytes_accessed=4 * batch * seq * d_model * itemsize
        + (seq * seq * 4 if has_mask else 0))

    kernel = _make_flash_kernel(head_offsets, head_dim, has_mask, shared_kv)

    return pl.pallas_call(
        kernel,
        out_shape=jax.ShapeDtypeStruct((batch, seq, d_model), qkv.dtype),
        grid_spec=pltpu.PrefetchScalarGridSpec(
            num_scalar_prefetch=0,
            grid=grid,
            in_specs=in_specs,
            out_specs=out_spec,
            scratch_shapes=[
                pltpu.VMEM((tq, n_hb), jnp.float32),       # running max m
                pltpu.VMEM((tq, n_hb), jnp.float32),       # running denom l
                pltpu.VMEM((tq, out_width), jnp.float32),  # f32 output accumulator
            ],
        ),
        compiler_params=pltpu.CompilerParams(
            dimension_semantics=("parallel", "parallel", "parallel", "arbitrary"),
            vmem_limit_bytes=vmem_limit),
        cost_estimate=cost,
    )(*operands)


# ---------------------------------------------------------------------------
# Full MultiHeadAttention forward
# ---------------------------------------------------------------------------
def multi_head_attention(x, params, num_heads, mask=None):
    """x: [batch, seq, d_model] -> [batch, seq, d_model]."""
    w_qkv, b_qkv, w_out, b_out = params
    batch, seq, d_model = x.shape
    head_dim = d_model // num_heads
    M = batch * seq

    # TODO(synk): in a real model do this weight reordering once at load time
    #             (and store weights in bf16 on v6e/v7x with f32 accumulation).
    w_qkv_p, b_qkv_p = _prepare_qkv_params(w_qkv, b_qkv, num_heads, head_dim)

    # Fused QKV projection; output columns already in [Q | K | V] head-major
    # order, so attention reads them in place (no activation transposes).
    qkv = linear(x.reshape(M, d_model), w_qkv_p, b_qkv_p)           # [M, 3*d_model]

    values = flash_attention(qkv.reshape(batch, seq, 3 * d_model), mask,
                             num_heads=num_heads, head_dim=head_dim)  # [B,S,d_model]

    out = linear(values.reshape(M, d_model), w_out, b_out)           # [M, d_model]
    return out.reshape(batch, seq, d_model)


# ---------------------------------------------------------------------------
# Reference + init (mirrors the PyTorch module)
# ---------------------------------------------------------------------------
def init_params(key, d_model, dtype=jnp.float32):
    """Mimics torch.nn.Linear default init; weights stored as (in, out)."""
    k1, k2, k3, k4 = jax.random.split(key, 4)
    bound = 1.0 / math.sqrt(d_model)
    w_qkv = jax.random.uniform(k1, (d_model, 3 * d_model), dtype, -bound, bound)
    b_qkv = jax.random.uniform(k2, (3 * d_model,), dtype, -bound, bound)
    w_out = jax.random.uniform(k3, (d_model, d_model), dtype, -bound, bound)
    b_out = jax.random.uniform(k4, (d_model,), dtype, -bound, bound)
    return w_qkv, b_qkv, w_out, b_out


def mha_reference(x, params, num_heads, mask=None):
    """Pure-JAX reference (same math as the PyTorch module, HIGHEST precision)."""
    w_qkv, b_qkv, w_out, b_out = params
    b, s, d = x.shape
    hd = d // num_heads
    hi = lax.Precision.HIGHEST
    qkv = jnp.matmul(x, w_qkv, precision=hi) + b_qkv
    qkv = qkv.reshape(b, s, num_heads, 3 * hd).transpose(0, 2, 1, 3)
    q, k, v = jnp.split(qkv, 3, axis=-1)
    scores = jnp.einsum('bhqd,bhkd->bhqk', q, k, precision=hi) / math.sqrt(hd)
    if mask is not None:
        scores = scores + mask
    attn = jax.nn.softmax(scores, axis=-1)
    vals = jnp.einsum('bhqk,bhkd->bhqd', attn, v, precision=hi)
    vals = vals.transpose(0, 2, 1, 3).reshape(b, s, d)
    return jnp.matmul(vals, w_out, precision=hi) + b_out


if __name__ == "__main__":
    batch, seq, d_model, num_heads = 2, 8, 64, 4

    key = jax.random.PRNGKey(0)
    kx, kp = jax.random.split(key)
    x = jax.random.normal(kx, (batch, seq, d_model), jnp.float32)
    params = init_params(kp, d_model)

    # Tolerance accounts for the EUP approx-reciprocal softmax normalization and
    # MXU f32 rounding vs the HIGHEST-precision reference.
    tol = dict(atol=5e-3, rtol=5e-3)

    # unmasked variant
    out = jax.block_until_ready(multi_head_attention(x, params, num_heads))
    ref = mha_reference(x, params, num_heads)
    assert out.shape == (batch, seq, d_model)
    assert jnp.allclose(out, ref, **tol), float(jnp.max(jnp.abs(out - ref)))

    # causal-mask variant (additive (S, S) mask, broadcast over batch/heads)
    causal = jnp.where(jnp.tril(jnp.ones((seq, seq), bool)), 0.0, -1e9).astype(jnp.float32)
    out_m = jax.block_until_ready(multi_head_attention(x, params, num_heads, mask=causal))
    ref_m = mha_reference(x, params, num_heads, mask=causal)
    assert jnp.allclose(out_m, ref_m, **tol), float(jnp.max(jnp.abs(out_m - ref_m)))

    print("KERNEL_OK")
</pallas_src>

<mosaic_0001>
module attributes {stable_mosaic.version = 11 : i64} {
  func.func @_linear_kernel(%arg0: i32, %arg1: i32, %arg2: i32, %arg3: memref<16x64xf32, #tpu.memory_space<vmem>>, %arg4: memref<64x192xf32, #tpu.memory_space<vmem>>, %arg5: memref<1x192xf32, #tpu.memory_space<vmem>>, %arg6: memref<16x192xf32, #tpu.memory_space<vmem>>, %arg7: memref<16x192xf32, #tpu.memory_space<vmem>>) attributes {dimension_semantics = [#tpu.dimension_semantics<parallel>, #tpu.dimension_semantics<parallel>, #tpu.dimension_semantics<arbitrary>], iteration_bounds = array<i64: 1, 1, 1>, scalar_prefetch = 0 : i64, scratch_operands = 1 : i64, tpu.core_type = #tpu.core_type<tc>, window_params = [{transform_indices = @transform_0, window_bounds = array<i64: 16, 64>}, {transform_indices = @transform_1, window_bounds = array<i64: 64, 192>}, {transform_indices = @transform_2, window_bounds = array<i64: 1, 192>}, {transform_indices = @transform_3, window_bounds = array<i64: 16, 192>}]} {
    %c0_i32 = arith.constant 0 : i32
    %0 = arith.cmpi eq, %arg2, %c0_i32 : i32
    %1 = arith.extui %0 : i1 to i32
    %c0_i32_0 = arith.constant 0 : i32
    %2 = arith.cmpi ne, %1, %c0_i32_0 : i32
    scf.if %2 {
      %cst_10 = arith.constant 0.000000e+00 : f32
      %12 = vector.broadcast %cst_10 : f32 to vector<16x192xf32>
      %c0_11 = arith.constant 0 : index
      %c0_12 = arith.constant 0 : index
      %13 = vector.load %arg7[%c0_11, %c0_12] : memref<16x192xf32, #tpu.memory_space<vmem>>, vector<16x192xf32>
      tpu.vector_store %arg7[%c0_11, %c0_12], %12 {strides = array<i32>} : memref<16x192xf32, #tpu.memory_space<vmem>>, vector<16x192xf32>,
    } else {
    }
    %c0 = arith.constant 0 : index
    %c0_1 = arith.constant 0 : index
    %3 = vector.load %arg7[%c0, %c0_1] : memref<16x192xf32, #tpu.memory_space<vmem>>, vector<16x192xf32>
    %c0_2 = arith.constant 0 : index
    %c0_3 = arith.constant 0 : index
    %4 = vector.load %arg3[%c0_2, %c0_3] : memref<16x64xf32, #tpu.memory_space<vmem>>, vector<16x64xf32>
    %c0_4 = arith.constant 0 : index
    %c0_5 = arith.constant 0 : index
    %5 = vector.load %arg4[%c0_4, %c0_5] : memref<64x192xf32, #tpu.memory_space<vmem>>, vector<64x192xf32>
    %cst = arith.constant dense<0.000000e+00> : vector<16x192xf32>
    %6 = tpu.matmul %4, %5, %cst {dimension_numbers = #tpu.dot_dimension_numbers<[1], [0], [0], [1], [0, 0, 1, 1], [], []>} : vector<16x64xf32>, vector<64x192xf32>, vector<16x192xf32> -> vector<16x192xf32>
    %7 = arith.addf %3, %6 : vector<16x192xf32>
    %c0_6 = arith.constant 0 : index
    %c0_7 = arith.constant 0 : index
    %8 = vector.load %arg7[%c0_6, %c0_7] : memref<16x192xf32, #tpu.memory_space<vmem>>, vector<16x192xf32>
    tpu.vector_store %arg7[%c0_6, %c0_7], %7 {strides = array<i32>} : memref<16x192xf32, #tpu.memory_space<vmem>>, vector<16x192xf32>,
    %c0_i32_8 = arith.constant 0 : i32
    %9 = arith.cmpi eq, %arg2, %c0_i32_8 : i32
    %10 = arith.extui %9 : i1 to i32
    %c0_i32_9 = arith.constant 0 : i32
    %11 = arith.cmpi ne, %10, %c0_i32_9 : i32
    scf.if %11 {
      %c0_10 = arith.constant 0 : index
      %c0_11 = arith.constant 0 : index
      %12 = vector.load %arg7[%c0_10, %c0_11] : memref<16x192xf32, #tpu.memory_space<vmem>>, vector<16x192xf32>
      %c0_12 = arith.constant 0 : index
      %c0_13 = arith.constant 0 : index
      %13 = vector.load %arg5[%c0_12, %c0_13] : memref<1x192xf32, #tpu.memory_space<vmem>>, vector<1x192xf32>
      %14 = vector.broadcast %13 : vector<1x192xf32> to vector<16x192xf32>
      %15 = arith.addf %12, %14 : vector<16x192xf32>
      %c0_14 = arith.constant 0 : index
      %c0_15 = arith.constant 0 : index
      %16 = vector.load %arg6[%c0_14, %c0_15] : memref<16x192xf32, #tpu.memory_space<vmem>>, vector<16x192xf32>
      tpu.vector_store %arg6[%c0_14, %c0_15], %15 {strides = array<i32>} : memref<16x192xf32, #tpu.memory_space<vmem>>, vector<16x192xf32>,
    } else {
    }
    return
  }
  func.func @transform_0(%arg0: i32, %arg1: i32, %arg2: i32) -> (i32, i32) {
    %c0_i32 = arith.constant 0 : i32
    return %arg0, %arg2 : i32, i32
  }
  func.func @transform_1(%arg0: i32, %arg1: i32, %arg2: i32) -> (i32, i32) {
    %c0_i32 = arith.constant 0 : i32
    return %arg2, %arg1 : i32, i32
  }
  func.func @transform_2(%arg0: i32, %arg1: i32, %arg2: i32) -> (i32, i32) {
    %c0_i32 = arith.constant 0 : i32
    %c0_i32_0 = arith.constant 0 : i32
    return %c0_i32, %arg1 : i32, i32
  }
  func.func @transform_3(%arg0: i32, %arg1: i32, %arg2: i32) -> (i32, i32) {
    %c0_i32 = arith.constant 0 : i32
    return %arg0, %arg1 : i32, i32
  }
}

</mosaic_0001>

<bundles_post_ra>
// kernel: tpu_custom_call.1
= control target key start
LH: loop header
LB: loop body
LE: loop exit
PB: predicated region body
PF: predicated region fallthrough
CT: control target
= control target key end

     0   :  { %8 = vsyncpa [#allocation4], 0  ;;  %s381_s0 = inlined_call_operand.hbm [shape: f32[16,64], index: 0, kind: input, shape index: {}]   ;;  %s382_s1 = inlined_call_operand.hbm [shape: f32[64,192], index: 1, kind: input, shape index: {}]   ;;  %s383_s2 = inlined_call_operand.hbm [shape: f32[1,192], index: 2, kind: input, shape index: {}]   ;;  %s384_s3 = inlined_call_operand.hbm [shape: f32[16,192], index: 3, kind: output, shape index: {}]  }
   0x1   :  { %9 = vsyncpa [#allocation7], 0  ;;  %s28_s14 = sshll.u32 %s382_s1, 4  ;;  %s29_s14 = int_to_ptr.hbm [resolvable:$true] %s28_s14 }
   0x2   :  { %10 = vsyncpa [#allocation5], 0  ;;  %s324_s15 = smov [#allocation6]   ;;  %s15_s19 = sshll.u32 %s381_s0, 4  ;;  %s16_s19 = int_to_ptr.hbm [resolvable:$true] %s15_s19 }
   0x3   :  { %s30_s16 = sshll.u32 %s324_s15, 4  ;;  %s325_s20 = smov 256   ;;  %s31_s16 = int_to_ptr.vmem [resolvable:$true] %s30_s16 }
   0x4   :  { %s326_s21 = smov 16   ;;  %s327_s22 = smov [#allocation3]  }
   0x5   :  { %36 = dma.hbm_to_vmem [thread:$0]  %s29_s14, 2048, %s31_s16, [#allocation7], %s325_s20, %s325_s20, %s326_s21  }
   0x6   :  { %s17_s23 = sshll.u32 %s327_s22, 4  ;;  %s328_s1 = smov 128   ;;  %s18_s23 = int_to_ptr.vmem [resolvable:$true] %s17_s23 }
   0x7   :  { %s329_s24 = smov 8   ;;  %s42_s27 = sshll.u32 %s383_s2, 4  ;;  %s43_s27 = int_to_ptr.hbm [resolvable:$true] %s42_s27 }
   0x8   :  { %23 = dma.hbm_to_vmem [thread:$0]  %s16_s19, 256, %s18_s23, [#allocation4], %s328_s1, %s328_s1, %s329_s24  }
   0x9   :  { %s330_s28 = smov [#allocation8]  }
   0xa   :  { %s44_s0 = sshll.u32 %s330_s28, 4  ;;  %s45_s0 = int_to_ptr.vmem [resolvable:$true] %s44_s0 }
   0xb   :  { %47 = dma.hbm_to_vmem [thread:$0]  %s43_s27, 32, %s45_s0, [#allocation7]  }
   0xc   :  { %318 = dma.done.wait [#allocation4], 256  }
   0xd   :  { %319 = vsyncadd [#allocation4], 4294967040 }
   0xe   :  { %320 = dma.done.wait [#allocation7], 2080  }
   0xf   :  { %321 = vsyncadd [#allocation7], 4294965216  ;;  %vm65_vm0 = vcmask 523264   ;;  %v331_v0 = vmov 0.0   ;;  %v89_v1 = vld [vmem:[#allocation6 + $0x70] sm:$0xff]  ;;  %v90_v2 = vld [vmem:[#allocation6 + $0x78] sm:$0xff] }
  0x10   :  { %66 = vst.msk [vmem:[#allocation2 + $0x8] sm:$0xff] %vm65_vm0, %v331_v0  ;;  %v87_v3 = vld [vmem:[#allocation6 + $0x60] sm:$0xff]  ;;  %197 = vmatpush.msra.mxu2 %v89_v1  ;;  %205 = vmatpush.msra.mxu3 %v90_v2  ;;  %v88_v4 = vld [vmem:[#allocation6 + $0x68] sm:$0xff]  ;;  %v85_v5 = vld [vmem:[#allocation6 + $0x50] sm:$0xff]  ;;  %s332_s2 = smov [#allocation9]   ;;  %s179_s5 = sshll.u32 %s384_s3, 4  ;;  %s180_s5 = int_to_ptr.hbm [resolvable:$true] %s179_s5 }
  0x11   :  { %68 = vst.msk [vmem:[#allocation2 + $0x18] sm:$0xff] %vm65_vm0, %v331_v0  ;;  %v86_v6 = vld [vmem:[#allocation6 + $0x58] sm:$0xff]  ;;  %106 = vmatpush.msra.mxu0 %v89_v1  ;;  %129 = vmatpush.msra.mxu1 %v90_v2  ;;  %v83_v7 = vld [vmem:[#allocation6 + $0x40] sm:$0xff]  ;;  %v84_v8 = vld [vmem:[#allocation6 + $0x48] sm:$0xff]  ;;  %s177_s29 = sshll.u32 %s332_s2, 4  ;;  %s178_s29 = int_to_ptr.vmem [resolvable:$true] %s177_s29 }
  0x12   :  { %198 = vmatpush.msra.mxu2 %v87_v3  ;;  %206 = vmatpush.msra.mxu3 %v88_v4  ;;  %v81_v9 = vld [vmem:[#allocation6 + $0x30] sm:$0xff]  ;;  %v82_v10 = vld [vmem:[#allocation6 + $0x38] sm:$0xff]  ;;  %v79_v11 = vld [vmem:[#allocation6 + $0x20] sm:$0xff] }
  0x13   :  { %107 = vmatpush.msra.mxu0 %v87_v3  ;;  %130 = vmatpush.msra.mxu1 %v88_v4  ;;  %v80_v12 = vld [vmem:[#allocation6 + $0x28] sm:$0xff]  ;;  %v77_v13 = vld [vmem:[#allocation6 + $0x10] sm:$0xff]  ;;  %v78_v14 = vld [vmem:[#allocation6 + $0x18] sm:$0xff] }
  0x14   :  { %199 = vmatpush.msra.mxu2 %v85_v5  ;;  %207 = vmatpush.msra.mxu3 %v86_v6  ;;  %v75_v15 = vld [vmem:[#allocation6] sm:$0xff]  ;;  %v76_v16 = vld [vmem:[#allocation6 + $0x8] sm:$0xff]  ;;  %v74_v17 = vld [vmem:[#allocation3 + $0x8] sm:$0xff] }
  0x15   :  { %108 = vmatpush.msra.mxu0 %v85_v5  ;;  %131 = vmatpush.msra.mxu1 %v86_v6  ;;  %v73_v18 = vld [vmem:[#allocation3] sm:$0xff]  ;;  %v159_v19 = vld [vmem:[#allocation8] sm:$0x3] }
  0x16   :  { %200 = vmatpush.msra.mxu2 %v83_v7  ;;  %208 = vmatpush.msra.mxu3 %v84_v8  ;;  %v161_v21 = vperm.slane %v159_v19, 0  ;;  %v162_v31 = vperm.slane %v159_v19, 1 }
  0x17   :  { %109 = vmatpush.msra.mxu0 %v83_v7  ;;  %132 = vmatpush.msra.mxu1 %v84_v8  ;;  %v70_v20 = vld [vmem:[#allocation2 + $0x8] sm:$0xff] }
  0x18   :  { %201 = vmatpush.msra.mxu2 %v81_v9  ;;  %209 = vmatpush.msra.mxu3 %v82_v10  ;;  %v72_v25 = vld [vmem:[#allocation2 + $0x18] sm:$0xff] }
  0x19   :  { %110 = vmatpush.msra.mxu0 %v81_v9  ;;  %133 = vmatpush.msra.mxu1 %v82_v10 }
  0x1a   :  { %202 = vmatpush.msra.mxu2 %v79_v11  ;;  %210 = vmatpush.msra.mxu3 %v80_v12 }
  0x1b   :  { %111 = vmatpush.msra.mxu0 %v79_v11  ;;  %134 = vmatpush.msra.mxu1 %v80_v12 }
  0x1c   :  { %203 = vmatpush.msra.mxu2 %v77_v13  ;;  %211 = vmatpush.msra.mxu3 %v78_v14 }
  0x1d   :  { %112 = vmatpush.msra.mxu0 %v77_v13  ;;  %135 = vmatpush.msra.mxu1 %v78_v14 }
  0x1e   :  { %204 = vmatpush.msra.mxu2 %v75_v15  ;;  %212 = vmatpush.msra.mxu3 %v76_v16 }
  0x1f   :  { %194 = vmatmul.msk.f32.vlgmr.msra.gmra.mxu2 %vm65_vm0, %v74_v17  ;;  %196 = vmatmul.msk.f32.vlgmr.msra.gmra.mxu3 %vm65_vm0, %v74_v17 }
  0x20   :  { %113 = vmatpush.msra.mxu0 %v75_v15  ;;  %136 = vmatpush.msra.mxu1 %v76_v16 }
  0x21   :  { %193 = vmatmul.msk.f32.vlgmr.msra.gmra.mxu0 %vm65_vm0, %v73_v18  ;;  %195 = vmatmul.msk.f32.vlgmr.msra.gmra.mxu1 %vm65_vm0, %v73_v18 }
  0x9e   :  { %v115_v22 = vpop.f32.mrf.mxu0  ;;  %v138_v23 = vpop.f32.mrf.mxu1 }
  0x9f   :  { %v145_v24 = vadd.f32 %v138_v23, %v70_v20  ;;  %v165_v26 = vadd.f32 %v161_v21, %v115_v22 }
  0xa1   :  { %149 = vst.msk [vmem:[#allocation2 + $0x8] sm:$0xff] %vm65_vm0, %v145_v24 }
  0xa2   :  { %v118_v27 = vpop.f32.mrf.mxu2  ;;  %v141_v28 = vpop.f32.mrf.mxu3  ;;  %169 = vst [vmem:[#allocation9] sm:$0xff] %v165_v26 }
  0xa3   :  { %v147_v29 = vadd.f32 %v141_v28, %v72_v25  ;;  %v167_v30 = vadd.f32 %v161_v21, %v118_v27 }
  0xa5   :  { %151 = vst.msk [vmem:[#allocation2 + $0x18] sm:$0xff] %vm65_vm0, %v147_v29 }
  0xa6   :  { %171 = vst [vmem:[#allocation9 + $0x10] sm:$0xff] %v167_v30 }
  0xa8   :  { %v156_v32 = vld [vmem:[#allocation2 + $0x8] sm:$0xff] }
  0xa9   :  { %v166_v33 = vadd.f32 %v162_v31, %v156_v32 }
  0xab   :  { %170 = vst.msk [vmem:[#allocation9 + $0x8] sm:$0xff] %vm65_vm0, %v166_v33 }
  0xac   :  { %v158_v34 = vld [vmem:[#allocation2 + $0x18] sm:$0xff] }
  0xad   :  { %v168_v35 = vadd.f32 %v162_v31, %v158_v34 }
  0xaf   :  { %172 = vst.msk [vmem:[#allocation9 + $0x18] sm:$0xff] %vm65_vm0, %v168_v35 }
  0xb0   :  { %185 = dma.vmem_to_hbm [thread:$0]  %s178_s29, 512, %s180_s5, [#allocation5], %s325_s20, %s325_s20, %s326_s21  }
  0xb1   :  { %322 = dma.done.wait [#allocation5], 512  }
  0xb2   :  { %323 = vsyncadd [#allocation5], 4294966784 }
  0xb3   :  { %190 = vsyncpa [#allocation4], 1 }
  0xb4   :  { %191 = vsyncpa [#allocation7], 1 }
  0xb5   :  { %192 = vsyncpa [#allocation5], 1 }

</bundles_post_ra>
